<compile_context>
chip_gen: v5e
topology: v5e:2x2
jax: 0.10.0
libtpu: 0.0.40
codegen_flags: <defaults>
</compile_context>

<pallas_src>
import jax
import jax.numpy as jnp
from jax.experimental import pallas as pl
from jax.experimental.pallas import tpu as pltpu


def _mlp_kernel(xi_ref, xj_ref, *rest):
    """Fused LinkPredictor forward on one batch tile.

    rest = (w_0, b_0, w_1, b_1, ..., w_L, b_L, o_ref).  Weights are pre-transposed and
    block-diagonalised on the host, so every layer is a plain `h @ W` on the MXU with
    no in-kernel transposes or relayouts.
    """
    o_ref = rest[-1]
    prefs = rest[:-1]
    n_lin = len(prefs) // 2

    # Elementwise product of the two node embeddings (VPU), in the stream dtype.
    # (bf16 on v6e/v7x is native; on v5e Mosaic widens internally.)
    h = xi_ref[...] * xj_ref[...]

    for l in range(n_lin):
        w = prefs[2 * l][...]
        b = prefs[2 * l + 1][...]
        z = jnp.dot(h, w, preferred_element_type=jnp.float32) + b   # MXU, f32 accumulate
        if l + 1 < n_lin:
            # Hidden layer: ReLU, then back to the stream/compute dtype for the next MXU feed.
            h = jnp.maximum(z, 0.0).astype(w.dtype)
        else:
            # Output head: sigmoid in f32 (EUP exp + VPU divide).  Output block is
            # (tile/pack, pack*out) -> only tile*out values per step (negligible traffic).
            o_ref[...] = 1.0 / (1.0 + jnp.exp(-z))


def prepare_params(params, *, stream_dtype=jnp.bfloat16):
    """One-time host-side weight prep.

    params = ((W0, b0), ..., (WL, bL)) with Wk of shape [out_f, in_f] (PyTorch layout),
    bk of shape [1, out_f].  Returns (pack, layers) where each layer's weight is the
    transposed, block-diagonalised [pack*in_f, pack*out_f] matrix (stream dtype) and the
    bias is tiled to [1, pack*out_f] (f32).
    """
    in_c = params[0][0].shape[1]
    pack = 128 // in_c if (in_c <= 128 and 128 % in_c == 0) else 1
    stream_dtype = jnp.dtype(stream_dtype)

    layers = []
    for w, b in params:
        wt = jnp.asarray(w, jnp.float32).T                      # [in_f, out_f]
        if pack > 1:
            wt = jnp.kron(jnp.eye(pack, dtype=jnp.float32), wt)  # block-diagonal
        bt = jnp.tile(jnp.asarray(b, jnp.float32).reshape(1, -1), (1, pack))
        layers.append((wt.astype(stream_dtype), bt))
    return pack, tuple(layers)


def link_predictor(x_i, x_j, prepared, *, tile_b=8192):
    """sigmoid(MLP(x_i * x_j)) -> (N, out_channels).  prepared = prepare_params(params)."""
    pack, layers = prepared
    stream_dtype = layers[0][0].dtype
    n, in_c = x_i.shape
    feat = pack * in_c
    out_c = layers[-1][0].shape[1] // pack

    # ---- tile sizing -------------------------------------------------------------
    align = max(512, 8 * pack)                      # keeps every block (8,128)-legal
    tile = max(align, (int(tile_b) // align) * align)
    n_ceil = pl.cdiv(n, align) * align
    tile = min(tile, n_ceil)
    # Keep >= 4 grid steps when the batch allows it: both v7x TensorCores get work
    # under dimension_semantics=("parallel",) and DMA/compute overlap is preserved.
    if n_ceil // tile < 4:
        tile = max(align, ((n_ceil // 4) // align) * align)

    # VMEM budgeting (double-buffered inputs/outputs + resident weights), ~40 MiB cap:
    # comfortably inside v7x's 64 MiB physical VMEM and well under v5e/v6e's 128 MiB.
    def _blk(rows, cols, itemsize):                 # lane/sublane-padded block bytes
        return (pl.cdiv(rows, 8) * 8) * (pl.cdiv(cols, 128) * 128) * itemsize

    def _vmem_est(t):
        est = 2 * 2 * _blk(t // pack, feat, stream_dtype.itemsize)      # 2 inputs x 2 bufs
        est += 2 * _blk(t // pack, pack * out_c, 4)                     # output x 2 bufs
        for w, b in layers:
            est += 2 * (_blk(w.shape[0], w.shape[1], w.dtype.itemsize)
                        + _blk(b.shape[0], b.shape[1], 4))
        return est + (1 << 20)

    budget = 40 << 20
    while _vmem_est(tile) > budget and tile > align:
        tile = max(align, ((tile // 2) // align) * align)

    n_pad = pl.cdiv(n, tile) * tile
    grid = n_pad // tile
    rows = tile // pack

    # ---- input prep (cast / pad fuse upstream or are no-ops in a real pipeline) ---
    if x_i.dtype != stream_dtype:
        x_i = x_i.astype(stream_dtype)              # halves HBM read traffic when bf16
        x_j = x_j.astype(stream_dtype)
    if n_pad != n:
        cfg = ((0, n_pad - n), (0, 0))
        x_i = jnp.pad(x_i, cfg)
        x_j = jnp.pad(x_j, cfg)
    # Lane-dense view: row-major (n_pad, in_c) == (n_pad/pack, pack*in_c); free reshape.
    xi = x_i.reshape(n_pad // pack, feat)
    xj = x_j.reshape(n_pad // pack, feat)

    # ---- specs --------------------------------------------------------------------
    in_specs = [pl.BlockSpec((rows, feat), lambda i: (i, 0)),
                pl.BlockSpec((rows, feat), lambda i: (i, 0))]
    flat_args = [xi, xj]
    for w, b in layers:                             # constant index maps -> VMEM-resident
        in_specs.append(pl.BlockSpec(w.shape, lambda i: (0, 0)))
        in_specs.append(pl.BlockSpec(b.shape, lambda i: (0, 0)))
        flat_args += [w, b]

    out = pl.pallas_call(
        _mlp_kernel,
        grid=(grid,),
        out_shape=jax.ShapeDtypeStruct((n_pad // pack, pack * out_c), jnp.float32),
        in_specs=in_specs,
        out_specs=pl.BlockSpec((rows, pack * out_c), lambda i: (i, 0)),
        compiler_params=pltpu.CompilerParams(
            dimension_semantics=("parallel",),      # shard batch grid on v7x's 2 TCs
            vmem_limit_bytes=int(min(48 << 20, max(32 << 20, 2 * _vmem_est(tile)))),
        ),
    )(*flat_args)

    # (n_pad/pack, pack*out) row-major == (n_pad, out); drop padded tail rows.
    return out.reshape(n_pad, out_c)[:n]


# ----------------------------------------------------------------------------------
def init_params(key, in_channels, hidden_channels, out_channels, num_layers):
    """Deterministic init mimicking torch.nn.Linear default (uniform +/- 1/sqrt(fan_in))."""
    dims = [in_channels] + [hidden_channels] * (num_layers - 1) + [out_channels]
    params = []
    for fan_in, fan_out in zip(dims[:-1], dims[1:]):
        key, kw, kb = jax.random.split(key, 3)
        bound = 1.0 / (fan_in ** 0.5)
        w = jax.random.uniform(kw, (fan_out, fan_in), jnp.float32, -bound, bound)
        b = jax.random.uniform(kb, (1, fan_out), jnp.float32, -bound, bound)
        params.append((w, b))
    return tuple(params)


def reference(x_i, x_j, params):
    x = x_i * x_j
    for w, b in params[:-1]:
        x = jnp.maximum(x @ w.T + b, 0.0)
    w, b = params[-1]
    return 1.0 / (1.0 + jnp.exp(-(x @ w.T + b)))


if __name__ == "__main__":
    in_channels = 32
    hidden_channels = 32
    out_channels = 1
    num_layers = 3
    batch = 200        # not a tile multiple -> exercises padding + the packed reshape

    key = jax.random.PRNGKey(0)
    k_i, k_j, k_p = jax.random.split(key, 3)
    x_i = jax.random.normal(k_i, (batch, in_channels), jnp.float32)
    x_j = jax.random.normal(k_j, (batch, in_channels), jnp.float32)
    params = init_params(k_p, in_channels, hidden_channels, out_channels, num_layers)

    ref = reference(x_i, x_j, params)

    # Exact path: f32 streaming, matches the PyTorch module numerics.
    prep_f32 = prepare_params(params, stream_dtype=jnp.float32)
    out_f32 = jax.block_until_ready(link_predictor(x_i, x_j, prep_f32))
    assert out_f32.shape == (batch, out_channels)
    assert jnp.allclose(out_f32, ref, atol=3e-5, rtol=1e-4), "f32 path mismatch vs reference"

    # Fast path: bf16 input streaming (~2x less HBM read traffic), looser tolerance.
    prep_bf16 = prepare_params(params, stream_dtype=jnp.bfloat16)
    out_bf16 = jax.block_until_ready(link_predictor(x_i, x_j, prep_bf16))
    assert out_bf16.shape == (batch, out_channels)
    assert jnp.allclose(out_bf16, ref, atol=2e-2, rtol=2e-2), "bf16 path mismatch vs reference"

    print("KERNEL_OK")
</pallas_src>

<mosaic_0001>
module attributes {stable_mosaic.version = 11 : i64} {
  func.func @_mlp_kernel(%arg0: i32, %arg1: memref<128x128xf32, #tpu.memory_space<vmem>>, %arg2: memref<128x128xf32, #tpu.memory_space<vmem>>, %arg3: memref<128x128xf32, #tpu.memory_space<vmem>>, %arg4: memref<1x128xf32, #tpu.memory_space<vmem>>, %arg5: memref<128x128xf32, #tpu.memory_space<vmem>>, %arg6: memref<1x128xf32, #tpu.memory_space<vmem>>, %arg7: memref<128x4xf32, #tpu.memory_space<vmem>>, %arg8: memref<1x4xf32, #tpu.memory_space<vmem>>, %arg9: memref<128x4xf32, #tpu.memory_space<vmem>>) attributes {dimension_semantics = [#tpu.dimension_semantics<parallel>], iteration_bounds = array<i64: 1>, scalar_prefetch = 0 : i64, scratch_operands = 0 : i64, tpu.core_type = #tpu.core_type<tc>, window_params = [{transform_indices = @transform_0, window_bounds = array<i64: 128, 128>}, {transform_indices = @transform_1, window_bounds = array<i64: 128, 128>}, {pipeline_mode = #tpu.pipeline_mode<synchronous>, transform_indices = @transform_2, window_bounds = array<i64: 128, 128>}, {pipeline_mode = #tpu.pipeline_mode<synchronous>, transform_indices = @transform_3, window_bounds = array<i64: 1, 128>}, {pipeline_mode = #tpu.pipeline_mode<synchronous>, transform_indices = @transform_4, window_bounds = array<i64: 128, 128>}, {pipeline_mode = #tpu.pipeline_mode<synchronous>, transform_indices = @transform_5, window_bounds = array<i64: 1, 128>}, {pipeline_mode = #tpu.pipeline_mode<synchronous>, transform_indices = @transform_6, window_bounds = array<i64: 128, 4>}, {pipeline_mode = #tpu.pipeline_mode<synchronous>, transform_indices = @transform_7, window_bounds = array<i64: 1, 4>}, {transform_indices = @transform_8, window_bounds = array<i64: 128, 4>}]} {
    %c0 = arith.constant 0 : index
    %c0_0 = arith.constant 0 : index
    %0 = vector.load %arg1[%c0, %c0_0] : memref<128x128xf32, #tpu.memory_space<vmem>>, vector<128x128xf32>
    %c0_1 = arith.constant 0 : index
    %c0_2 = arith.constant 0 : index
    %1 = vector.load %arg2[%c0_1, %c0_2] : memref<128x128xf32, #tpu.memory_space<vmem>>, vector<128x128xf32>
    %2 = arith.mulf %0, %1 : vector<128x128xf32>
    %c0_3 = arith.constant 0 : index
    %c0_4 = arith.constant 0 : index
    %3 = vector.load %arg3[%c0_3, %c0_4] : memref<128x128xf32, #tpu.memory_space<vmem>>, vector<128x128xf32>
    %c0_5 = arith.constant 0 : index
    %c0_6 = arith.constant 0 : index
    %4 = vector.load %arg4[%c0_5, %c0_6] : memref<1x128xf32, #tpu.memory_space<vmem>>, vector<1x128xf32>
    %cst = arith.constant dense<0.000000e+00> : vector<128x128xf32>
    %5 = tpu.matmul %2, %3, %cst {dimension_numbers = #tpu.dot_dimension_numbers<[1], [0], [0], [1], [0, 0, 1, 1], [], []>} : vector<128x128xf32>, vector<128x128xf32>, vector<128x128xf32> -> vector<128x128xf32>
    %6 = vector.broadcast %4 : vector<1x128xf32> to vector<128x128xf32>
    %7 = arith.addf %5, %6 : vector<128x128xf32>
    %cst_7 = arith.constant 0.000000e+00 : f32
    %8 = vector.broadcast %cst_7 : f32 to vector<128x128xf32>
    %9 = arith.maximumf %7, %8 : vector<128x128xf32>
    %c0_8 = arith.constant 0 : index
    %c0_9 = arith.constant 0 : index
    %10 = vector.load %arg5[%c0_8, %c0_9] : memref<128x128xf32, #tpu.memory_space<vmem>>, vector<128x128xf32>
    %c0_10 = arith.constant 0 : index
    %c0_11 = arith.constant 0 : index
    %11 = vector.load %arg6[%c0_10, %c0_11] : memref<1x128xf32, #tpu.memory_space<vmem>>, vector<1x128xf32>
    %cst_12 = arith.constant dense<0.000000e+00> : vector<128x128xf32>
    %12 = tpu.matmul %9, %10, %cst_12 {dimension_numbers = #tpu.dot_dimension_numbers<[1], [0], [0], [1], [0, 0, 1, 1], [], []>} : vector<128x128xf32>, vector<128x128xf32>, vector<128x128xf32> -> vector<128x128xf32>
    %13 = vector.broadcast %11 : vector<1x128xf32> to vector<128x128xf32>
    %14 = arith.addf %12, %13 : vector<128x128xf32>
    %cst_13 = arith.constant 0.000000e+00 : f32
    %15 = vector.broadcast %cst_13 : f32 to vector<128x128xf32>
    %16 = arith.maximumf %14, %15 : vector<128x128xf32>
    %c0_14 = arith.constant 0 : index
    %c0_15 = arith.constant 0 : index
    %17 = vector.load %arg7[%c0_14, %c0_15] : memref<128x4xf32, #tpu.memory_space<vmem>>, vector<128x4xf32>
    %c0_16 = arith.constant 0 : index
    %c0_17 = arith.constant 0 : index
    %18 = vector.load %arg8[%c0_16, %c0_17] : memref<1x4xf32, #tpu.memory_space<vmem>>, vector<1x4xf32>
    %cst_18 = arith.constant dense<0.000000e+00> : vector<128x4xf32>
    %19 = tpu.matmul %16, %17, %cst_18 {dimension_numbers = #tpu.dot_dimension_numbers<[1], [0], [0], [1], [0, 0, 1, 1], [], []>} : vector<128x128xf32>, vector<128x4xf32>, vector<128x4xf32> -> vector<128x4xf32>
    %20 = vector.broadcast %18 : vector<1x4xf32> to vector<128x4xf32>
    %21 = arith.addf %19, %20 : vector<128x4xf32>
    %cst_19 = arith.constant 0.000000e+00 : f32
    %22 = vector.broadcast %cst_19 : f32 to vector<128x4xf32>
    %23 = arith.subf %22, %21 : vector<128x4xf32>
    %24 = math.exp %23 : vector<128x4xf32>
    %cst_20 = arith.constant 1.000000e+00 : f32
    %25 = vector.broadcast %cst_20 : f32 to vector<128x4xf32>
    %26 = arith.addf %25, %24 : vector<128x4xf32>
    %cst_21 = arith.constant 1.000000e+00 : f32
    %27 = vector.broadcast %cst_21 : f32 to vector<128x4xf32>
    %28 = arith.divf %27, %26 : vector<128x4xf32>
    %c0_22 = arith.constant 0 : index
    %c0_23 = arith.constant 0 : index
    %29 = vector.load %arg9[%c0_22, %c0_23] : memref<128x4xf32, #tpu.memory_space<vmem>>, vector<128x4xf32>
    tpu.vector_store %arg9[%c0_22, %c0_23], %28 {strides = array<i32>} : memref<128x4xf32, #tpu.memory_space<vmem>>, vector<128x4xf32>,
    return
  }
  func.func @transform_0(%arg0: i32) -> (i32, i32) {
    %c0_i32 = arith.constant 0 : i32
    %c0_i32_0 = arith.constant 0 : i32
    return %arg0, %c0_i32 : i32, i32
  }
  func.func @transform_1(%arg0: i32) -> (i32, i32) {
    %c0_i32 = arith.constant 0 : i32
    %c0_i32_0 = arith.constant 0 : i32
    return %arg0, %c0_i32 : i32, i32
  }
  func.func @transform_2(%arg0: i32) -> (i32, i32) {
    %c0_i32 = arith.constant 0 : i32
    %c0_i32_0 = arith.constant 0 : i32
    %c0_i32_1 = arith.constant 0 : i32
    return %c0_i32, %c0_i32_0 : i32, i32
  }
  func.func @transform_3(%arg0: i32) -> (i32, i32) {
    %c0_i32 = arith.constant 0 : i32
    %c0_i32_0 = arith.constant 0 : i32
    %c0_i32_1 = arith.constant 0 : i32
    return %c0_i32, %c0_i32_0 : i32, i32
  }
  func.func @transform_4(%arg0: i32) -> (i32, i32) {
    %c0_i32 = arith.constant 0 : i32
    %c0_i32_0 = arith.constant 0 : i32
    %c0_i32_1 = arith.constant 0 : i32
    return %c0_i32, %c0_i32_0 : i32, i32
  }
  func.func @transform_5(%arg0: i32) -> (i32, i32) {
    %c0_i32 = arith.constant 0 : i32
    %c0_i32_0 = arith.constant 0 : i32
    %c0_i32_1 = arith.constant 0 : i32
    return %c0_i32, %c0_i32_0 : i32, i32
  }
  func.func @transform_6(%arg0: i32) -> (i32, i32) {
    %c0_i32 = arith.constant 0 : i32
    %c0_i32_0 = arith.constant 0 : i32
    %c0_i32_1 = arith.constant 0 : i32
    return %c0_i32, %c0_i32_0 : i32, i32
  }
  func.func @transform_7(%arg0: i32) -> (i32, i32) {
    %c0_i32 = arith.constant 0 : i32
    %c0_i32_0 = arith.constant 0 : i32
    %c0_i32_1 = arith.constant 0 : i32
    return %c0_i32, %c0_i32_0 : i32, i32
  }
  func.func @transform_8(%arg0: i32) -> (i32, i32) {
    %c0_i32 = arith.constant 0 : i32
    %c0_i32_0 = arith.constant 0 : i32
    return %arg0, %c0_i32 : i32, i32
  }
}

</mosaic_0001>

<bundles_post_ra>
// kernel: tpu_custom_call.1
= control target key start
LH: loop header
LB: loop body
LE: loop exit
PB: predicated region body
PF: predicated region fallthrough
CT: control target
= control target key end

     0   :  { %13 = vsyncpa [#allocation3], 0  ;;  %s1330_s0 = inlined_call_operand.vmem [shape: f32[128,128], index: 0, kind: input, shape index: {}]   ;;  %s1331_s1 = inlined_call_operand.hbm [shape: f32[128,128], index: 1, kind: input, shape index: {}]   ;;  %s1332_s2 = inlined_call_operand.hbm [shape: f32[128,128], index: 2, kind: input, shape index: {}]   ;;  %s1333_s3 = inlined_call_operand.vmem [shape: f32[1,128], index: 3, kind: input, shape index: {}]   ;;  %s1334_s4 = inlined_call_operand.hbm [shape: f32[128,128], index: 4, kind: input, shape index: {}]   ;;  %s1335_s5 = inlined_call_operand.vmem [shape: f32[1,128], index: 5, kind: input, shape index: {}]   ;;  %s1336_s6 = inlined_call_operand.vmem [shape: f32[128,4], index: 6, kind: input, shape index: {}]   ;;  %s1337_s7 = inlined_call_operand.vmem [shape: f32[1,4], index: 7, kind: input, shape index: {}]   ;;  %s1338_s8 = inlined_call_operand.vmem [shape: f32[128,4], index: 8, kind: output, shape index: {}]  }
   0x1   :  { %14 = vsyncpa [#allocation5], 0  ;;  %s34_s29 = sshll.u32 %s1332_s2, 4  ;;  %s934_s30 = smov [#allocation4]   ;;  %s35_s29 = int_to_ptr.hbm [resolvable:$true] %s34_s29 }
   0x2   :  { %s36_s9 = sshll.u32 %s934_s30, 4  ;;  %s21_s12 = sshll.u32 %s1331_s1, 4  ;;  %s37_s9 = int_to_ptr.vmem [resolvable:$true] %s36_s9  ;;  %s22_s12 = int_to_ptr.hbm [resolvable:$true] %s21_s12 }
   0x3   :  { %s935_s13 = smov 128   ;;  %s936_s14 = smov 8  }
   0x4   :  { %42 = dma.hbm_to_vmem [thread:$0]  %s35_s29, 2048, %s37_s9, [#allocation5], %s935_s13, %s935_s13, %s936_s14  }
   0x5   :  { %s937_s15 = smov [#allocation2]   ;;  %s49_s19 = sshll.u32 %s1334_s4, 4  ;;  %s50_s19 = int_to_ptr.hbm [resolvable:$true] %s49_s19 }
   0x6   :  { %s23_s16 = sshll.u32 %s937_s15, 4  ;;  %s938_s2 = smov [#allocation6]   ;;  %s24_s16 = int_to_ptr.vmem [resolvable:$true] %s23_s16 }
   0x7   :  { %29 = dma.hbm_to_vmem [thread:$0]  %s22_s12, 2048, %s24_s16, [#allocation3], %s935_s13, %s935_s13, %s936_s14  }
   0x8   :  { %s51_s20 = sshll.u32 %s938_s2, 4  ;;  %s52_s20 = int_to_ptr.vmem [resolvable:$true] %s51_s20 }
   0x9   :  { %57 = dma.hbm_to_vmem [thread:$0]  %s50_s19, 2048, %s52_s20, [#allocation5], %s935_s13, %s935_s13, %s936_s14  }
   0xa   :  { %930 = dma.done.wait [#allocation3], 2048  }
   0xb   :  { %931 = vsyncadd [#allocation3], 4294965248 }
   0xc   :  { %932 = dma.done.wait [#allocation5], 4096  }
   0xd   :  { %933 = vsyncadd [#allocation5], 4294963200  ;;  %v139_v0 = vld [vmem:[#allocation4 + $0x78] sm:$0xff]  ;;  %v138_v1 = vld [vmem:[#allocation4 + $0x70] sm:$0xff]  ;;  %vm715_vm3 = vcmask 31744  }
   0xe   :  { %144 = vmatpush.msra.mxu0 %v139_v0  ;;  %738 = vmatpush.msra.mxu3 %v139_v0  ;;  %v137_v2 = vld [vmem:[#allocation4 + $0x68] sm:$0xff]  ;;  %v136_v3 = vld [vmem:[#allocation4 + $0x60] sm:$0xff]  ;;  %v135_v4 = vld [vmem:[#allocation4 + $0x58] sm:$0xff] }
   0xf   :  { %v134_v5 = vld [vmem:[#allocation4 + $0x50] sm:$0xff]  ;;  %v133_v6 = vld [vmem:[#allocation4 + $0x48] sm:$0xff]  ;;  %v132_v7 = vld [vmem:[#allocation4 + $0x40] sm:$0xff] }
  0x10   :  { %145 = vmatpush.msra.mxu0 %v138_v1  ;;  %739 = vmatpush.msra.mxu3 %v138_v1  ;;  %v131_v8 = vld [vmem:[#allocation4 + $0x38] sm:$0xff]  ;;  %v130_v9 = vld [vmem:[#allocation4 + $0x30] sm:$0xff]  ;;  %v129_v10 = vld [vmem:[#allocation4 + $0x28] sm:$0xff] }
  0x11   :  { %v128_v11 = vld [vmem:[#allocation4 + $0x20] sm:$0xff]  ;;  %v127_v12 = vld [vmem:[#allocation4 + $0x18] sm:$0xff]  ;;  %v126_v13 = vld [vmem:[#allocation4 + $0x10] sm:$0xff] }
  0x12   :  { %146 = vmatpush.msra.mxu0 %v137_v2  ;;  %740 = vmatpush.msra.mxu3 %v137_v2  ;;  %v76_v14 = vld [vmem:[%s1330_s0] sm:$0xff]  ;;  %v125_v16 = vld [vmem:[#allocation4 + $0x8] sm:$0xff]  ;;  %v78_v27 = vld [vmem:[%s1330_s0 + $0x10] sm:$0xff] }
  0x13   :  { %v92_v15 = vld [vmem:[#allocation2] sm:$0xff]  ;;  %v77_v21 = vld [vmem:[%s1330_s0 + $0x8] sm:$0xff]  ;;  %v94_v28 = vld [vmem:[#allocation2 + $0x10] sm:$0xff] }
  0x14   :  { %147 = vmatpush.msra.mxu0 %v136_v3  ;;  %741 = vmatpush.msra.mxu3 %v136_v3  ;;  %v124_v17 = vld [vmem:[#allocation4] sm:$0xff]  ;;  %v108_v18 = vmul.f32 %v92_v15, %v76_v14  ;;  %v93_v22 = vld [vmem:[#allocation2 + $0x8] sm:$0xff]  ;;  %v110_v30 = vmul.f32 %v94_v28, %v78_v27  ;;  %v90_v31 = vld [vmem:[%s1330_s0 + $0x70] sm:$0xff] }
  0x15   :  { %v88_v19 = vld [vmem:[%s1330_s0 + $0x60] sm:$0xff]  ;;  %v109_v24 = vmul.f32 %v93_v22, %v77_v21  ;;  %v89_v25 = vld [vmem:[%s1330_s0 + $0x68] sm:$0xff]  ;;  %v106_v32 = vld [vmem:[#allocation2 + $0x70] sm:$0xff] }
  0x16   :  { %148 = vmatpush.msra.mxu0 %v135_v4  ;;  %742 = vmatpush.msra.mxu3 %v135_v4  ;;  %v104_v20 = vld [vmem:[#allocation2 + $0x60] sm:$0xff]  ;;  %v105_v26 = vld [vmem:[#allocation2 + $0x68] sm:$0xff]  ;;  %v79_v33 = vld [vmem:[%s1330_s0 + $0x18] sm:$0xff]  ;;  %v122_v35 = vmul.f32 %v106_v32, %v90_v31 }
  0x17   :  { %v120_v23 = vmul.f32 %v104_v20, %v88_v19  ;;  %v121_v29 = vmul.f32 %v105_v26, %v89_v25  ;;  %v95_v34 = vld [vmem:[#allocation2 + $0x18] sm:$0xff]  ;;  %v80_v39 = vld [vmem:[%s1330_s0 + $0x20] sm:$0xff]  ;;  %v81_v43 = vld [vmem:[%s1330_s0 + $0x28] sm:$0xff] }
  0x18   :  { %149 = vmatpush.msra.mxu0 %v134_v5  ;;  %743 = vmatpush.msra.mxu3 %v134_v5  ;;  %v111_v36 = vmul.f32 %v95_v34, %v79_v33  ;;  %v91_v37 = vld [vmem:[%s1330_s0 + $0x78] sm:$0xff]  ;;  %v96_v40 = vld [vmem:[#allocation2 + $0x20] sm:$0xff]  ;;  %v97_v44 = vld [vmem:[#allocation2 + $0x28] sm:$0xff] }
  0x19   :  { %v107_v38 = vld [vmem:[#allocation2 + $0x78] sm:$0xff]  ;;  %v112_v42 = vmul.f32 %v96_v40, %v80_v39  ;;  %v113_v45 = vmul.f32 %v97_v44, %v81_v43  ;;  %v82_v46 = vld [vmem:[%s1330_s0 + $0x30] sm:$0xff]  ;;  %v84_v54 = vld [vmem:[%s1330_s0 + $0x40] sm:$0xff] }
  0x1a   :  { %150 = vmatpush.msra.mxu0 %v133_v6  ;;  %744 = vmatpush.msra.mxu3 %v133_v6  ;;  %v123_v41 = vmul.f32 %v107_v38, %v91_v37  ;;  %v98_v47 = vld [vmem:[#allocation2 + $0x30] sm:$0xff]  ;;  %v83_v49 = vld [vmem:[%s1330_s0 + $0x38] sm:$0xff]  ;;  %v100_v55 = vld [vmem:[#allocation2 + $0x40] sm:$0xff] }
  0x1b   :  { %v114_v48 = vmul.f32 %v98_v47, %v82_v46  ;;  %v99_v50 = vld [vmem:[#allocation2 + $0x38] sm:$0xff]  ;;  %v239_v53 = vld [vmem:[#allocation6 + $0x70] sm:$0xff]  ;;  %v238_v56 = vld [vmem:[#allocation6 + $0x68] sm:$0xff]  ;;  %v116_v57 = vmul.f32 %v100_v55, %v84_v54 }
  0x1c   :  { %151 = vmatpush.msra.mxu0 %v132_v7  ;;  %745 = vmatpush.msra.mxu3 %v132_v7  ;;  %v115_v51 = vmul.f32 %v99_v50, %v83_v49  ;;  %v240_v52 = vld [vmem:[#allocation6 + $0x78] sm:$0xff]  ;;  %v237_v58 = vld [vmem:[#allocation6 + $0x60] sm:$0xff]  ;;  %v235_v60 = vld [vmem:[#allocation6 + $0x50] sm:$0xff] }
  0x1d   :  { %245 = vmatpush.msra.mxu1 %v240_v52  ;;  %v236_v59 = vld [vmem:[#allocation6 + $0x58] sm:$0xff]  ;;  %v85_v61 = vld [vmem:[%s1330_s0 + $0x48] sm:$0xff]  ;;  %v233_v1 = vld [vmem:[#allocation6 + $0x40] sm:$0xff] }
  0x1e   :  { %152 = vmatpush.msra.mxu0 %v131_v8  ;;  %746 = vmatpush.msra.mxu3 %v131_v8  ;;  %v101_v62 = vld [vmem:[#allocation2 + $0x48] sm:$0xff]  ;;  %v232_v2 = vld [vmem:[#allocation6 + $0x38] sm:$0xff]  ;;  %v231_v3 = vld [vmem:[#allocation6 + $0x30] sm:$0xff] }
  0x1f   :  { %246 = vmatpush.msra.mxu1 %v239_v53  ;;  %v234_v63 = vld [vmem:[#allocation6 + $0x48] sm:$0xff]  ;;  %v117_v0 = vmul.f32 %v101_v62, %v85_v61  ;;  %v86_v4 = vld [vmem:[%s1330_s0 + $0x50] sm:$0xff]  ;;  %v229_v8 = vld [vmem:[#allocation6 + $0x20] sm:$0xff] }
  0x20   :  { %153 = vmatpush.msra.mxu0 %v130_v9  ;;  %747 = vmatpush.msra.mxu3 %v130_v9  ;;  %v102_v5 = vld [vmem:[#allocation2 + $0x50] sm:$0xff]  ;;  %v230_v6 = vld [vmem:[#allocation6 + $0x28] sm:$0xff]  ;;  %v228_v9 = vld [vmem:[#allocation6 + $0x18] sm:$0xff] }
  0x21   :  { %247 = vmatpush.msra.mxu1 %v238_v56  ;;  %v118_v7 = vmul.f32 %v102_v5, %v86_v4  ;;  %v226_v14 = vld [vmem:[#allocation6 + $0x8] sm:$0xff]  ;;  %v225_v15 = vld [vmem:[#allocation6] sm:$0xff]  ;;  %v340_v54 = vld [vmem:[%s1336_s6 + $0x70] sm:$0xff] }
  0x22   :  { %154 = vmatpush.msra.mxu0 %v129_v10  ;;  %748 = vmatpush.msra.mxu3 %v129_v10  ;;  %v87_v10 = vld [vmem:[%s1330_s0 + $0x58] sm:$0xff]  ;;  %v339_v55 = vld [vmem:[%s1336_s6 + $0x68] sm:$0xff]  ;;  %v336_v61 = vld [vmem:[%s1336_s6 + $0x50] sm:$0xff] }
  0x23   :  { %248 = vmatpush.msra.mxu1 %v237_v58  ;;  %v335_v62 = vld [vmem:[%s1336_s6 + $0x48] sm:$0xff]  ;;  %v332_v4 = vld [vmem:[%s1336_s6 + $0x30] sm:$0xff] }
  0x24   :  { %155 = vmatpush.msra.mxu0 %v128_v11  ;;  %749 = vmatpush.msra.mxu3 %v128_v11  ;;  %v103_v11 = vld [vmem:[#allocation2 + $0x58] sm:$0xff]  ;;  %v331_v5 = vld [vmem:[%s1336_s6 + $0x28] sm:$0xff] }
  0x25   :  { %249 = vmatpush.msra.mxu1 %v236_v59 }
  0x26   :  { %156 = vmatpush.msra.mxu0 %v127_v12  ;;  %750 = vmatpush.msra.mxu3 %v127_v12  ;;  %v119_v12 = vmul.f32 %v103_v11, %v87_v10  ;;  %v329_v10 = vld [vmem:[%s1336_s6 + $0x18] sm:$0xff] }
  0x27   :  { %250 = vmatpush.msra.mxu1 %v235_v60 }
  0x28   :  { %157 = vmatpush.msra.mxu0 %v126_v13  ;;  %751 = vmatpush.msra.mxu3 %v126_v13  ;;  %v227_v13 = vld [vmem:[#allocation6 + $0x10] sm:$0xff] }
  0x29   :  { %251 = vmatpush.msra.mxu1 %v234_v63 }
  0x2a   :  { %158 = vmatpush.msra.mxu0 %v125_v16  ;;  %752 = vmatpush.msra.mxu3 %v125_v16  ;;  %v1044_v16 = vld [vmem:[%s1333_s3] ss:$0 sm:$0xff] }
  0x2b   :  { %252 = vmatpush.msra.mxu1 %v233_v1 }
  0x2c   :  { %159 = vmatpush.msra.mxu0 %v124_v17  ;;  %753 = vmatpush.msra.mxu3 %v124_v17 }
  0x2d   :  { %160 = vmatmul.f32.vlgmr.msra.gmra.mxu0 %v108_v18  ;;  %196 = vmatmul.f32.vlgmr.msra.gmra.mxu3 %v120_v23 }
  0x2e   :  { %754 = vmatpush.msrb.mxu3 %v240_v52  ;;  %253 = vmatpush.msra.mxu1 %v232_v2 }
  0x30   :  { %755 = vmatpush.msrb.mxu3 %v239_v53  ;;  %254 = vmatpush.msra.mxu1 %v231_v3  ;;  %v341_v53 = vld [vmem:[%s1336_s6 + $0x78] sm:$0xff] }
  0x31   :  { %346 = vmatpush.msra.mxu2 %v341_v53 }
  0x32   :  { %756 = vmatpush.msrb.mxu3 %v238_v56  ;;  %255 = vmatpush.msra.mxu1 %v230_v6 }
  0x33   :  { %347 = vmatpush.msra.mxu2 %v340_v54 }
  0x34   :  { %757 = vmatpush.msrb.mxu3 %v237_v58  ;;  %256 = vmatpush.msra.mxu1 %v229_v8  ;;  %v338_v58 = vld [vmem:[%s1336_s6 + $0x60] sm:$0xff] }
  0x35   :  { %163 = vmatmul.f32.gmra.mxu0 %v109_v24  ;;  %199 = vmatmul.f32.gmra.mxu3 %v121_v29 }
  0x36   :  { %758 = vmatpush.msrb.mxu3 %v236_v59  ;;  %257 = vmatpush.msra.mxu1 %v228_v9 }
  0x37   :  { %348 = vmatpush.msra.mxu2 %v339_v55 }
  0x38   :  { %759 = vmatpush.msrb.mxu3 %v235_v60  ;;  %258 = vmatpush.msra.mxu1 %v227_v13  ;;  %v337_v60 = vld [vmem:[%s1336_s6 + $0x58] sm:$0xff] }
  0x39   :  { %349 = vmatpush.msra.mxu2 %v338_v58 }
  0x3a   :  { %760 = vmatpush.msrb.mxu3 %v234_v63  ;;  %259 = vmatpush.msra.mxu1 %v226_v14 }
  0x3b   :  { %350 = vmatpush.msra.mxu2 %v337_v60 }
  0x3c   :  { %761 = vmatpush.msrb.mxu3 %v233_v1  ;;  %260 = vmatpush.msra.mxu1 %v225_v15  ;;  %v334_v1 = vld [vmem:[%s1336_s6 + $0x40] sm:$0xff] }
  0x3d   :  { %166 = vmatmul.f32.gmra.mxu0 %v110_v30  ;;  %202 = vmatmul.f32.gmra.mxu3 %v122_v35 }
  0x3e   :  { %762 = vmatpush.msrb.mxu3 %v232_v2  ;;  %351 = vmatpush.msra.mxu2 %v336_v61 }
  0x40   :  { %763 = vmatpush.msrb.mxu3 %v231_v3  ;;  %352 = vmatpush.msra.mxu2 %v335_v62  ;;  %v333_v3 = vld [vmem:[%s1336_s6 + $0x38] sm:$0xff] }
  0x42   :  { %764 = vmatpush.msrb.mxu3 %v230_v6  ;;  %353 = vmatpush.msra.mxu2 %v334_v1 }
  0x44   :  { %765 = vmatpush.msrb.mxu3 %v229_v8  ;;  %354 = vmatpush.msra.mxu2 %v333_v3  ;;  %v330_v8 = vld [vmem:[%s1336_s6 + $0x20] sm:$0xff] }
  0x45   :  { %169 = vmatmul.f32.gmra.mxu0 %v111_v36  ;;  %205 = vmatmul.f32.gmra.mxu3 %v123_v41 }
  0x46   :  { %766 = vmatpush.msrb.mxu3 %v228_v9  ;;  %355 = vmatpush.msra.mxu2 %v332_v4 }
  0x48   :  { %767 = vmatpush.msrb.mxu3 %v227_v13  ;;  %356 = vmatpush.msra.mxu2 %v331_v5 }
  0x4a   :  { %768 = vmatpush.msrb.mxu3 %v226_v14  ;;  %357 = vmatpush.msra.mxu2 %v330_v8  ;;  %v328_v14 = vld [vmem:[%s1336_s6 + $0x10] sm:$0xff] }
  0x4c   :  { %769 = vmatpush.msrb.mxu3 %v225_v15  ;;  %358 = vmatpush.msra.mxu2 %v329_v10  ;;  %v327_v15 = vld [vmem:[%s1336_s6 + $0x8] sm:$0xff] }
  0x4d   :  { %172 = vmatmul.f32.gmra.mxu0 %v112_v42 }
  0x4e   :  { %770 = vmatpush.msra.mxu3 %v341_v53  ;;  %359 = vmatpush.msra.mxu2 %v328_v14 }
  0x50   :  { %771 = vmatpush.msra.mxu3 %v340_v54  ;;  %360 = vmatpush.msra.mxu2 %v327_v15 }
  0x52   :  { %772 = vmatpush.msra.mxu3 %v339_v55 }
  0x54   :  { %773 = vmatpush.msra.mxu3 %v338_v58 }
  0x55   :  { %175 = vmatmul.f32.gmra.mxu0 %v113_v45 }
  0x56   :  { %774 = vmatpush.msra.mxu3 %v337_v60 }
  0x58   :  { %775 = vmatpush.msra.mxu3 %v336_v61 }
  0x5a   :  { %776 = vmatpush.msra.mxu3 %v335_v62 }
  0x5c   :  { %777 = vmatpush.msra.mxu3 %v334_v1 }
  0x5d   :  { %178 = vmatmul.f32.gmra.mxu0 %v114_v48 }
  0x5e   :  { %778 = vmatpush.msra.mxu3 %v333_v3 }
  0x60   :  { %779 = vmatpush.msra.mxu3 %v332_v4 }
  0x62   :  { %780 = vmatpush.msra.mxu3 %v331_v5 }
  0x64   :  { %781 = vmatpush.msra.mxu3 %v330_v8 }
  0x65   :  { %181 = vmatmul.f32.gmra.mxu0 %v115_v51 }
  0x66   :  { %782 = vmatpush.msra.mxu3 %v329_v10 }
  0x68   :  { %783 = vmatpush.msra.mxu3 %v328_v14 }
  0x6a   :  { %784 = vmatpush.msra.mxu3 %v327_v15 }
  0x6d   :  { %184 = vmatmul.f32.gmra.mxu0 %v116_v57 }
  0x75   :  { %187 = vmatmul.f32.gmra.mxu0 %v117_v0 }
  0x7d   :  { %190 = vmatmul.f32.gmra.mxu0 %v118_v7 }
  0x85   :  { %193 = vmatmul.f32.gmra.mxu0 %v119_v12 }
  0xaa   :  { %v161_v17 = vpop.f32.mrf.mxu0 }
  0xab   :  { %v162_v18 = vadd.f32 %v1044_v16, %v161_v17  ;;  %v326_v17 = vld [vmem:[%s1336_s6] sm:$0xff] }
  0xac   :  { %361 = vmatpush.msra.mxu2 %v326_v17  ;;  %785 = vmatpush.msra.mxu3 %v326_v17 }
  0xad   :  { %v209_v19 = vmax.f32 %v162_v18, 0.0 }
  0xaf   :  { %261 = vmatmul.f32.vlgmr.msra.gmra.mxu1 %v209_v19 }
  0xb0   :  { %v197_v23 = vpop.f32.mrf.mxu3 }
  0xb1   :  { %v198_v24 = vadd.f32 %v1044_v16, %v197_v23 }
  0xb2   :  { %v164_v20 = vpop.f32.mrf.mxu0 }
  0xb3   :  { %v165_v21 = vadd.f32 %v1044_v16, %v164_v20  ;;  %v221_v25 = vmax.f32 %v198_v24, 0.0 }
  0xb5   :  { %v210_v22 = vmax.f32 %v165_v21, 0.0  ;;  %297 = vmatmul.f32.vlgmr.msrb.gmra.mxu3 %v221_v25 }
  0xb7   :  { %264 = vmatmul.f32.gmra.mxu1 %v210_v22 }
  0xb8   :  { %v200_v29 = vpop.f32.mrf.mxu3 }
  0xb9   :  { %v201_v30 = vadd.f32 %v1044_v16, %v200_v29 }
  0xba   :  { %v167_v26 = vpop.f32.mrf.mxu0 }
  0xbb   :  { %v168_v27 = vadd.f32 %v1044_v16, %v167_v26  ;;  %v222_v31 = vmax.f32 %v201_v30, 0.0 }
  0xbd   :  { %v211_v28 = vmax.f32 %v168_v27, 0.0  ;;  %300 = vmatmul.f32.gmra.mxu3 %v222_v31 }
  0xbf   :  { %267 = vmatmul.f32.gmra.mxu1 %v211_v28 }
  0xc0   :  { %v203_v35 = vpop.f32.mrf.mxu3 }
  0xc1   :  { %v204_v36 = vadd.f32 %v1044_v16, %v203_v35 }
  0xc2   :  { %v170_v32 = vpop.f32.mrf.mxu0 }
  0xc3   :  { %v171_v33 = vadd.f32 %v1044_v16, %v170_v32  ;;  %v223_v37 = vmax.f32 %v204_v36, 0.0 }
  0xc5   :  { %v212_v34 = vmax.f32 %v171_v33, 0.0  ;;  %303 = vmatmul.f32.gmra.mxu3 %v223_v37 }
  0xc7   :  { %270 = vmatmul.f32.gmra.mxu1 %v212_v34 }
  0xc8   :  { %v206_v41 = vpop.f32.mrf.mxu3 }
  0xc9   :  { %v207_v42 = vadd.f32 %v1044_v16, %v206_v41 }
  0xca   :  { %v173_v38 = vpop.f32.mrf.mxu0 }
  0xcb   :  { %v174_v39 = vadd.f32 %v1044_v16, %v173_v38  ;;  %v224_v43 = vmax.f32 %v207_v42, 0.0 }
  0xcd   :  { %v213_v40 = vmax.f32 %v174_v39, 0.0  ;;  %306 = vmatmul.f32.gmra.mxu3 %v224_v43 }
  0xcf   :  { %273 = vmatmul.f32.gmra.mxu1 %v213_v40 }
  0xd2   :  { %v176_v44 = vpop.f32.mrf.mxu0 }
  0xd3   :  { %v177_v45 = vadd.f32 %v1044_v16, %v176_v44 }
  0xd5   :  { %v214_v46 = vmax.f32 %v177_v45, 0.0 }
  0xd7   :  { %276 = vmatmul.f32.gmra.mxu1 %v214_v46 }
  0xda   :  { %v179_v47 = vpop.f32.mrf.mxu0 }
  0xdb   :  { %v180_v48 = vadd.f32 %v1044_v16, %v179_v47 }
  0xdd   :  { %v215_v49 = vmax.f32 %v180_v48, 0.0 }
  0xdf   :  { %279 = vmatmul.f32.gmra.mxu1 %v215_v49 }
  0xe2   :  { %v182_v50 = vpop.f32.mrf.mxu0 }
  0xe3   :  { %v183_v51 = vadd.f32 %v1044_v16, %v182_v50 }
  0xe5   :  { %v216_v52 = vmax.f32 %v183_v51, 0.0 }
  0xe7   :  { %282 = vmatmul.f32.gmra.mxu1 %v216_v52 }
  0xea   :  { %v185_v56 = vpop.f32.mrf.mxu0 }
  0xeb   :  { %v186_v57 = vadd.f32 %v1044_v16, %v185_v56 }
  0xed   :  { %v217_v59 = vmax.f32 %v186_v57, 0.0 }
  0xef   :  { %285 = vmatmul.f32.gmra.mxu1 %v217_v59 }
  0xf2   :  { %v188_v63 = vpop.f32.mrf.mxu0 }
  0xf3   :  { %v189_v0 = vadd.f32 %v1044_v16, %v188_v63 }
  0xf5   :  { %v218_v2 = vmax.f32 %v189_v0, 0.0 }
  0xf7   :  { %288 = vmatmul.f32.gmra.mxu1 %v218_v2  ;;  %v1116_v2 = vld [vmem:[%s1337_s7] ss:$0 sm:$0xff] }
  0xfa   :  { %v191_v6 = vpop.f32.mrf.mxu0 }
  0xfb   :  { %v192_v7 = vadd.f32 %v1044_v16, %v191_v6 }
  0xfd   :  { %v219_v9 = vmax.f32 %v192_v7, 0.0 }
  0xff   :  { %291 = vmatmul.f32.gmra.mxu1 %v219_v9 }
 0x102   :  { %v194_v11 = vpop.f32.mrf.mxu0 }
 0x103   :  { %v195_v12 = vadd.f32 %v1044_v16, %v194_v11  ;;  %v792_v16 = vld [vmem:[%s1335_s5] ss:$0 sm:$0xff] }
 0x105   :  { %v220_v13 = vmax.f32 %v195_v12, 0.0 }
 0x107   :  { %294 = vmatmul.f32.gmra.mxu1 %v220_v13 }
 0x12c   :  { %v262_v18 = vpop.f32.mrf.mxu1 }
 0x12d   :  { %v263_v19 = vadd.f32 %v792_v16, %v262_v18 }
 0x12f   :  { %v310_v20 = vmax.f32 %v263_v19, 0.0 }
 0x131   :  { %362 = vmatmul.f32.vlgmr.msra.gmra.mxu2 %v310_v20 }
 0x134   :  { %v265_v21 = vpop.f32.mrf.mxu1 }
 0x135   :  { %v266_v22 = vadd.f32 %v792_v16, %v265_v21 }
 0x137   :  { %v311_v23 = vmax.f32 %v266_v22, 0.0 }
 0x138   :  { %v298_v27 = vpop.f32.mrf.mxu3 }
 0x139   :  { %365 = vmatmul.f32.gmra.mxu2 %v311_v23  ;;  %v299_v28 = vadd.f32 %v792_v16, %v298_v27 }
 0x13b   :  { %v322_v29 = vmax.f32 %v299_v28, 0.0 }
 0x13c   :  { %v268_v24 = vpop.f32.mrf.mxu1 }
 0x13d   :  { %v269_v25 = vadd.f32 %v792_v16, %v268_v24  ;;  %398 = vmatmul.f32.vlgmr.msra.gmra.mxu3 %v322_v29 }
 0x13f   :  { %v312_v26 = vmax.f32 %v269_v25, 0.0 }
 0x140   :  { %v301_v33 = vpop.f32.mrf.mxu3 }
 0x141   :  { %368 = vmatmul.f32.gmra.mxu2 %v312_v26  ;;  %v302_v34 = vadd.f32 %v792_v16, %v301_v33 }
 0x143   :  { %v323_v35 = vmax.f32 %v302_v34, 0.0 }
 0x144   :  { %v271_v30 = vpop.f32.mrf.mxu1 }
 0x145   :  { %v272_v31 = vadd.f32 %v792_v16, %v271_v30  ;;  %401 = vmatmul.f32.gmra.mxu3 %v323_v35 }
 0x147   :  { %v313_v32 = vmax.f32 %v272_v31, 0.0 }
 0x148   :  { %v304_v39 = vpop.f32.mrf.mxu3 }
 0x149   :  { %371 = vmatmul.f32.gmra.mxu2 %v313_v32  ;;  %v305_v40 = vadd.f32 %v792_v16, %v304_v39 }
 0x14b   :  { %v324_v41 = vmax.f32 %v305_v40, 0.0 }
 0x14c   :  { %v274_v36 = vpop.f32.mrf.mxu1 }
 0x14d   :  { %v275_v37 = vadd.f32 %v792_v16, %v274_v36  ;;  %404 = vmatmul.f32.gmra.mxu3 %v324_v41 }
 0x14f   :  { %v314_v38 = vmax.f32 %v275_v37, 0.0 }
 0x150   :  { %v307_v45 = vpop.f32.mrf.mxu3 }
 0x151   :  { %374 = vmatmul.f32.gmra.mxu2 %v314_v38  ;;  %v308_v46 = vadd.f32 %v792_v16, %v307_v45 }
 0x153   :  { %v325_v47 = vmax.f32 %v308_v46, 0.0 }
 0x154   :  { %v277_v42 = vpop.f32.mrf.mxu1 }
 0x155   :  { %v278_v43 = vadd.f32 %v792_v16, %v277_v42  ;;  %407 = vmatmul.f32.gmra.mxu3 %v325_v47 }
 0x157   :  { %v315_v44 = vmax.f32 %v278_v43, 0.0 }
 0x159   :  { %377 = vmatmul.f32.gmra.mxu2 %v315_v44 }
 0x15c   :  { %v280_v48 = vpop.f32.mrf.mxu1 }
 0x15d   :  { %v281_v49 = vadd.f32 %v792_v16, %v280_v48 }
 0x15f   :  { %v316_v50 = vmax.f32 %v281_v49, 0.0 }
 0x161   :  { %380 = vmatmul.f32.gmra.mxu2 %v316_v50 }
 0x164   :  { %v283_v51 = vpop.f32.mrf.mxu1 }
 0x165   :  { %v284_v52 = vadd.f32 %v792_v16, %v283_v51 }
 0x167   :  { %v317_v53 = vmax.f32 %v284_v52, 0.0 }
 0x169   :  { %383 = vmatmul.f32.gmra.mxu2 %v317_v53 }
 0x16c   :  { %v286_v54 = vpop.f32.mrf.mxu1 }
 0x16d   :  { %v287_v55 = vadd.f32 %v792_v16, %v286_v54 }
 0x16f   :  { %v318_v56 = vmax.f32 %v287_v55, 0.0 }
 0x171   :  { %386 = vmatmul.f32.gmra.mxu2 %v318_v56 }
 0x174   :  { %v289_v57 = vpop.f32.mrf.mxu1 }
 0x175   :  { %v290_v58 = vadd.f32 %v792_v16, %v289_v57 }
 0x177   :  { %v319_v59 = vmax.f32 %v290_v58, 0.0 }
 0x179   :  { %389 = vmatmul.f32.gmra.mxu2 %v319_v59 }
 0x17c   :  { %v292_v60 = vpop.f32.mrf.mxu1 }
 0x17d   :  { %v293_v61 = vadd.f32 %v792_v16, %v292_v60 }
 0x17f   :  { %v320_v62 = vmax.f32 %v293_v61, 0.0 }
 0x181   :  { %392 = vmatmul.f32.gmra.mxu2 %v320_v62 }
 0x184   :  { %v295_v63 = vpop.f32.mrf.mxu1 }
 0x185   :  { %v296_v0 = vadd.f32 %v792_v16, %v295_v63 }
 0x187   :  { %v321_v1 = vmax.f32 %v296_v0, 0.0 }
 0x189   :  { %395 = vmatmul.f32.gmra.mxu2 %v321_v1 }
 0x1b4   :  { %v363_v3 = vpop.f32.mrf.mxu2 }
 0x1b5   :  { %v364_v4 = vadd.f32 %v1116_v2, %v363_v3 }
 0x1b7   :  { %v411_v5 = vsub.f32 0.0, %v364_v4 }
 0x1b9   :  { %v427_v6 = vmul.f32 1.442695, %v411_v5 }
 0x1bb   :  { %794 = vpow2.f32 %v427_v6 }
 0x1bc   :  { %v366_v7 = vpop.f32.mrf.mxu2 }
 0x1bd   :  { %v367_v8 = vadd.f32 %v1116_v2, %v366_v7 }
 0x1bf   :  { %v412_v9 = vsub.f32 0.0, %v367_v8 }
 0x1c0   :  { %v399_v17 = vpop.f32.mrf.mxu3 }
 0x1c1   :  { %v795_v10 = vpop.eup %794  ;;  %v429_v11 = vmul.f32 1.442695, %v412_v9  ;;  %v400_v19 = vadd.f32 %v1116_v2, %v399_v17 }
 0x1c2   :  { %v459_v12 = vadd.f32 1.0, %v795_v10 }
 0x1c3   :  { %796 = vpow2.f32 %v429_v11  ;;  %v423_v23 = vsub.f32 0.0, %v400_v19 }
 0x1c4   :  { %798 = vrcp.f32 %v459_v12  ;;  %v369_v13 = vpop.f32.mrf.mxu2  ;;  %v484_v28 = vand.u32 2147483647, %v459_v12  ;;  %v486_v29 = vand.u32 2147483648, %v459_v12  ;;  %vm480_vm1 = vweird.f32 %v459_v12 }
 0x1c5   :  { %v370_v14 = vadd.f32 %v1116_v2, %v369_v13  ;;  %v451_v27 = vmul.f32 1.442695, %v423_v23 }
 0x1c6   :  { %v487_v38 = vor.u32 1.1754944e-38, %v486_v29  ;;  %vm485_vm4 = vcmp.eq.f32.partialorder %v484_v28, 8.507059e+37 }
 0x1c7   :  { %v413_v15 = vsub.f32 0.0, %v370_v14 }
 0x1c8   :  { %v402_v32 = vpop.f32.mrf.mxu3 }
 0x1c9   :  { %v797_v16 = vpop.eup %796  ;;  %v431_v18 = vmul.f32 1.442695, %v413_v15  ;;  %v403_v36 = vadd.f32 %v1116_v2, %v402_v32 }
 0x1ca   :  { %v799_v20 = vpop.eup %798  ;;  %v460_v21 = vadd.f32 1.0, %v797_v16 }
 0x1cb   :  { %v476_v22 = vmul.f32 %v799_v20, %v459_v12  ;;  %800 = vpow2.f32 %v431_v18  ;;  %vm481_vm0 = vweird.f32 %v799_v20  ;;  %v424_v47 = vsub.f32 0.0, %v403_v36 }
 0x1cc   :  { %802 = vrcp.f32 %v460_v21  ;;  %v372_v24 = vpop.f32.mrf.mxu2  ;;  %vm482_vm2 = vmor %vm480_vm1, %vm481_vm0  ;;  %v499_v48 = vand.u32 2147483647, %v460_v21  ;;  %v501_v49 = vand.u32 2147483648, %v460_v21  ;;  %vm495_vm6 = vweird.f32 %v460_v21 }
 0x1cd   :  { %v477_v25 = vsub.f32 1.0, %v476_v22  ;;  %v373_v26 = vadd.f32 %v1116_v2, %v372_v24  ;;  %804 = vpow2.f32 %v451_v27  ;;  %v453_v53 = vmul.f32 1.442695, %v424_v47 }
 0x1ce   :  { %v502_v59 = vor.u32 1.1754944e-38, %v501_v49  ;;  %vm500_vm8 = vcmp.eq.f32.partialorder %v499_v48, 8.507059e+37 }
 0x1cf   :  { %v478_v30 = vmul.f32 %v799_v20, %v477_v25  ;;  %v414_v31 = vsub.f32 0.0, %v373_v26 }
 0x1d0   :  { %v405_v54 = vpop.f32.mrf.mxu3 }
 0x1d1   :  { %v801_v33 = vpop.eup %800  ;;  %v479_v34 = vadd.f32 %v799_v20, %v478_v30  ;;  %v433_v35 = vmul.f32 1.442695, %v414_v31  ;;  %v406_v1 = vadd.f32 %v1116_v2, %v405_v54 }
 0x1d2   :  { %v803_v37 = vpop.eup %802  ;;  %v1124_v39 = vadd.f32 1.0, %v801_v33 }
 0x1d3   :  { %v483_v40 = vsel %vm482_vm2, %v799_v20, %v479_v34  ;;  %v491_v41 = vmul.f32 %v803_v37, %v460_v21  ;;  %806 = vpow2.f32 %v433_v35  ;;  %v805_v44 = vpop.eup %804  ;;  %vm496_vm5 = vweird.f32 %v803_v37 }
 0x1d4   :  { %v488_v42 = vsel %vm485_vm4, %v487_v38, %v483_v40  ;;  %808 = vrcp.f32 %v1124_v39  ;;  %v375_v43 = vpop.f32.mrf.mxu2  ;;  %v1132_v50 = vadd.f32 1.0, %v805_v44  ;;  %vm497_vm7 = vmor %vm495_vm6, %vm496_vm5  ;;  %v514_v6 = vand.u32 2147483647, %v1124_v39 }
 0x1d5   :  { %716 = vst.msk [vmem:[%s1338_s8] sm:$0xff] %vm715_vm3, %v488_v42  ;;  %v492_v45 = vsub.f32 1.0, %v491_v41  ;;  %v376_v46 = vadd.f32 %v1116_v2, %v375_v43  ;;  %v516_v7 = vand.u32 2147483648, %v1124_v39  ;;  %v425_v13 = vsub.f32 0.0, %v406_v1 }
 0x1d6   :  { %810 = vrcp.f32 %v1132_v50  ;;  %vm510_vm10 = vweird.f32 %v1124_v39  ;;  %vm515_vm12 = vcmp.eq.f32.partialorder %v514_v6, 8.507059e+37  ;;  %vm660_vm13 = vweird.f32 %v1132_v50 }
 0x1d7   :  { %v493_v51 = vmul.f32 %v803_v37, %v492_v45  ;;  %v415_v52 = vsub.f32 0.0, %v376_v46  ;;  %812 = vpow2.f32 %v453_v53  ;;  %v517_v20 = vor.u32 1.1754944e-38, %v516_v7 }
 0x1d8   :  { %v408_v18 = vpop.f32.mrf.mxu3  ;;  %v455_v26 = vmul.f32 1.442695, %v425_v13  ;;  %v664_v33 = vand.u32 2147483647, %v1132_v50 }
 0x1d9   :  { %v807_v55 = vpop.eup %806  ;;  %v494_v56 = vadd.f32 %v803_v37, %v493_v51  ;;  %v435_v57 = vmul.f32 1.442695, %v415_v52  ;;  %v409_v27 = vadd.f32 %v1116_v2, %v408_v18 }
 0x1da   :  { %v809_v58 = vpop.eup %808  ;;  %v1135_v60 = vadd.f32 1.0, %v807_v55  ;;  %vm1180_vm2 = vcmp.eq.f32.partialorder %v664_v33, 8.507059e+37 }
 0x1db   :  { %v498_v61 = vsel %vm497_vm7, %v803_v37, %v494_v56  ;;  %v506_v62 = vmul.f32 %v809_v58, %v1124_v39  ;;  %814 = vpow2.f32 %v435_v57  ;;  %vm511_vm9 = vweird.f32 %v809_v58 }
 0x1dc   :  { %v503_v63 = vsel %vm500_vm8, %v502_v59, %v498_v61  ;;  %816 = vrcp.f32 %v1135_v60  ;;  %v378_v0 = vpop.f32.mrf.mxu2  ;;  %v1145_v5 = vpop.eup %810  ;;  %vm512_vm11 = vmor %vm510_vm10, %vm511_vm9  ;;  %v531_v29 = vand.u32 2147483648, %v1135_v60  ;;  %v529_v32 = vand.u32 2147483647, %v1135_v60 }
 0x1dd   :  { %717 = vst.msk [vmem:[%s1338_s8 + $0x8] sm:$0xff] %vm715_vm3, %v503_v63  ;;  %v507_v3 = vsub.f32 1.0, %v506_v62  ;;  %v379_v4 = vadd.f32 %v1116_v2, %v378_v0  ;;  %v813_v8 = vpop.eup %812  ;;  %v656_v11 = vmul.f32 %v1145_v5, %v1132_v50  ;;  %vm661_vm14 = vweird.f32 %v1145_v5 }
 0x1de   :  { %v1151_v12 = vadd.f32 1.0, %v813_v8  ;;  %vm1172_vm0 = vmor %vm660_vm13, %vm661_vm14  ;;  %vm525_vm1 = vweird.f32 %v1135_v60  ;;  %v666_v39 = vand.u32 2147483648, %v1132_v50  ;;  %v426_v40 = vsub.f32 0.0, %v409_v27 }
 0x1df   :  { %v508_v9 = vmul.f32 %v809_v58, %v507_v3  ;;  %v416_v10 = vsub.f32 0.0, %v379_v4  ;;  %v657_v16 = vsub.f32 1.0, %v656_v11  ;;  %v532_v43 = vor.u32 1.1754944e-38, %v531_v29 }
 0x1e0   :  { %818 = vrcp.f32 %v1151_v12  ;;  %v667_v49 = vor.u32 1.1754944e-38, %v666_v39  ;;  %vm530_vm5 = vcmp.eq.f32.partialorder %v529_v32, 8.507059e+37  ;;  %v457_v56 = vmul.f32 1.442695, %v426_v40 }
 0x1e1   :  { %v815_v14 = vpop.eup %814  ;;  %v509_v15 = vadd.f32 %v809_v58, %v508_v9  ;;  %v437_v17 = vmul.f32 1.442695, %v416_v10  ;;  %v658_v31 = vmul.f32 %v1145_v5, %v657_v16  ;;  %vm675_vm8 = vweird.f32 %v1151_v12 }
 0x1e2   :  { %v817_v19 = vpop.eup %816  ;;  %v1154_v21 = vadd.f32 1.0, %v815_v14  ;;  %v679_v1 = vand.u32 2147483647, %v1151_v12  ;;  %v681_v4 = vand.u32 2147483648, %v1151_v12 }
 0x1e3   :  { %v513_v22 = vsel %vm512_vm11, %v809_v58, %v509_v15  ;;  %v521_v23 = vmul.f32 %v817_v19, %v1135_v60  ;;  %820 = vpow2.f32 %v437_v17  ;;  %vm526_vm15 = vweird.f32 %v817_v19 }
 0x1e4   :  { %v518_v24 = vsel %vm515_vm12, %v517_v20, %v513_v22  ;;  %822 = vrcp.f32 %v1154_v21  ;;  %v381_v25 = vpop.f32.mrf.mxu2  ;;  %v659_v36 = vadd.f32 %v1145_v5, %v658_v31  ;;  %vm527_vm4 = vmor %vm525_vm1, %vm526_vm15  ;;  %v544_v54 = vand.u32 2147483647, %v1154_v21 }
 0x1e5   :  { %718 = vst.msk [vmem:[%s1338_s8 + $0x10] sm:$0xff] %vm715_vm3, %v518_v24  ;;  %v522_v28 = vsub.f32 1.0, %v521_v23  ;;  %v382_v30 = vadd.f32 %v1116_v2, %v381_v25  ;;  %824 = vpow2.f32 %v455_v26  ;;  %v546_v58 = vand.u32 2147483648, %v1154_v21 }
 0x1e6   :  { %v1176_v38 = vpop.eup %818  ;;  %v663_v48 = vsel %vm1172_vm0, %v1145_v5, %v659_v36  ;;  %vm540_vm6 = vweird.f32 %v1154_v21  ;;  %vm545_vm11 = vcmp.eq.f32.partialorder %v544_v54, 8.507059e+37  ;;  %v682_v15 = vor.u32 1.1754944e-38, %v681_v4 }
 0x1e7   :  { %v523_v34 = vmul.f32 %v817_v19, %v522_v28  ;;  %v417_v35 = vsub.f32 0.0, %v382_v30  ;;  %v671_v50 = vmul.f32 %v1176_v38, %v1151_v12  ;;  %v668_v59 = vsel %vm1180_vm2, %v667_v49, %v663_v48 }
 0x1e8   :  { %728 = vst.msk [vmem:[%s1338_s8 + $0x60] sm:$0xff] %vm715_vm3, %v668_v59  ;;  %vm676_vm9 = vweird.f32 %v1176_v38  ;;  %v547_v8 = vor.u32 1.1754944e-38, %v546_v58  ;;  %vm680_vm13 = vcmp.eq.f32.partialorder %v679_v1, 8.507059e+37 }
 0x1e9   :  { %v821_v41 = vpop.eup %820  ;;  %v524_v42 = vadd.f32 %v817_v19, %v523_v34  ;;  %v439_v44 = vmul.f32 1.442695, %v417_v35  ;;  %v672_v62 = vsub.f32 1.0, %v671_v50  ;;  %vm1224_vm12 = vmor %vm675_vm8, %vm676_vm9 }
 0x1ea   :  { %v823_v46 = vpop.eup %822  ;;  %v1185_v47 = vadd.f32 1.0, %v821_v41 }
 0x1eb   :  { %v528_v51 = vsel %vm527_vm4, %v817_v19, %v524_v42  ;;  %v536_v52 = vmul.f32 %v823_v46, %v1154_v21  ;;  %826 = vpow2.f32 %v439_v44  ;;  %v825_v61 = vpop.eup %824  ;;  %vm541_vm7 = vweird.f32 %v823_v46 }
 0x1ec   :  { %v533_v53 = vsel %vm530_vm5, %v532_v43, %v528_v51  ;;  %828 = vrcp.f32 %v1185_v47  ;;  %v384_v55 = vpop.f32.mrf.mxu2  ;;  %v673_v3 = vmul.f32 %v1176_v38, %v672_v62  ;;  %v1213_v5 = vadd.f32 1.0, %v825_v61  ;;  %vm542_vm10 = vmor %vm540_vm6, %vm541_vm7 }
 0x1ed   :  { %719 = vst.msk [vmem:[%s1338_s8 + $0x18] sm:$0xff] %vm715_vm3, %v533_v53  ;;  %v537_v57 = vsub.f32 1.0, %v536_v52  ;;  %v385_v60 = vadd.f32 %v1116_v2, %v384_v55  ;;  %830 = vpow2.f32 %v457_v56  ;;  %v561_v23 = vand.u32 2147483648, %v1185_v47 }
 0x1ee   :  { %v674_v13 = vadd.f32 %v1176_v38, %v673_v3  ;;  %832 = vrcp.f32 %v1213_v5  ;;  %v559_v26 = vand.u32 2147483647, %v1185_v47  ;;  %vm555_vm15 = vweird.f32 %v1185_v47 }
 0x1ef   :  { %v538_v63 = vmul.f32 %v823_v46, %v537_v57  ;;  %v418_v0 = vsub.f32 0.0, %v385_v60  ;;  %v562_v35 = vor.u32 1.1754944e-38, %v561_v23  ;;  %vm690_vm2 = vweird.f32 %v1213_v5 }
 0x1f0   :  { %v678_v20 = vsel %vm1224_vm12, %v1176_v38, %v674_v13  ;;  %vm560_vm1 = vcmp.eq.f32.partialorder %v559_v26, 8.507059e+37  ;;  %v696_v40 = vand.u32 2147483648, %v1213_v5 }
 0x1f1   :  { %v827_v6 = vpop.eup %826  ;;  %v539_v7 = vadd.f32 %v823_v46, %v538_v63  ;;  %v441_v9 = vmul.f32 1.442695, %v418_v0  ;;  %v683_v24 = vsel %vm680_vm13, %v682_v15, %v678_v20 }
 0x1f2   :  { %v829_v10 = vpop.eup %828  ;;  %v1217_v11 = vadd.f32 1.0, %v827_v6  ;;  %729 = vst.msk [vmem:[%s1338_s8 + $0x68] sm:$0xff] %vm715_vm3, %v683_v24  ;;  %v697_v56 = vor.u32 1.1754944e-38, %v696_v40 }
 0x1f3   :  { %v543_v17 = vsel %vm542_vm10, %v823_v46, %v539_v7  ;;  %v551_v16 = vmul.f32 %v829_v10, %v1185_v47  ;;  %834 = vpow2.f32 %v441_v9  ;;  %v831_v22 = vpop.eup %830  ;;  %vm556_vm14 = vweird.f32 %v829_v10 }
 0x1f4   :  { %v548_v18 = vsel %vm545_vm11, %v547_v8, %v543_v17  ;;  %836 = vrcp.f32 %v1217_v11  ;;  %v387_v19 = vpop.f32.mrf.mxu2  ;;  %v833_v28 = vpop.eup %832  ;;  %v1245_v29 = vadd.f32 1.0, %v831_v22  ;;  %vm557_vm0 = vmor %vm555_vm15, %vm556_vm14  ;;  %v574_v45 = vand.u32 2147483647, %v1217_v11 }
 0x1f5   :  { %720 = vst.msk [vmem:[%s1338_s8 + $0x20] sm:$0xff] %vm715_vm3, %v548_v18  ;;  %v552_v12 = vsub.f32 1.0, %v551_v16  ;;  %v388_v21 = vadd.f32 %v1116_v2, %v387_v19  ;;  %v686_v33 = vmul.f32 %v833_v28, %v1213_v5  ;;  %vm691_vm4 = vweird.f32 %v833_v28 }
 0x1f6   :  { %838 = vrcp.f32 %v1245_v29  ;;  %v576_v46 = vand.u32 2147483648, %v1217_v11  ;;  %v694_v47 = vand.u32 2147483647, %v1213_v5  ;;  %vm570_vm6 = vweird.f32 %v1217_v11  ;;  %vm1267_vm7 = vmor %vm690_vm2, %vm691_vm4 }
 0x1f7   :  { %v553_v25 = vmul.f32 %v829_v10, %v552_v12  ;;  %v419_v27 = vsub.f32 0.0, %v388_v21  ;;  %v687_v43 = vsub.f32 1.0, %v686_v33  ;;  %vm575_vm10 = vcmp.eq.f32.partialorder %v574_v45, 8.507059e+37 }
 0x1f8   :  { %v577_v59 = vor.u32 1.1754944e-38, %v576_v46  ;;  %vm695_vm9 = vcmp.eq.f32.partialorder %v694_v47, 8.507059e+37  ;;  %vm705_vm11 = vweird.f32 %v1245_v29  ;;  %v711_v7 = vand.u32 2147483648, %v1245_v29 }
 0x1f9   :  { %v835_v30 = vpop.eup %834  ;;  %v554_v31 = vadd.f32 %v829_v10, %v553_v25  ;;  %v443_v32 = vmul.f32 1.442695, %v419_v27  ;;  %v688_v49 = vmul.f32 %v833_v28, %v687_v43  ;;  %v709_v9 = vand.u32 2147483647, %v1245_v29 }
 0x1fa   :  { %v837_v34 = vpop.eup %836  ;;  %v1249_v36 = vadd.f32 1.0, %v835_v30  ;;  %v712_v18 = vor.u32 1.1754944e-38, %v711_v7 }
 0x1fb   :  { %v558_v37 = vsel %vm557_vm0, %v829_v10, %v554_v31  ;;  %v566_v38 = vmul.f32 %v837_v34, %v1217_v11  ;;  %840 = vpow2.f32 %v443_v32  ;;  %vm571_vm5 = vweird.f32 %v837_v34 }
 0x1fc   :  { %v563_v39 = vsel %vm560_vm1, %v562_v35, %v558_v37  ;;  %842 = vrcp.f32 %v1249_v36  ;;  %v390_v41 = vpop.f32.mrf.mxu2  ;;  %v839_v51 = vpop.eup %838  ;;  %v689_v55 = vadd.f32 %v833_v28, %v688_v49  ;;  %vm572_vm8 = vmor %vm570_vm6, %vm571_vm5  ;;  %v591_v3 = vand.u32 2147483648, %v1249_v36 }
 0x1fd   :  { %721 = vst.msk [vmem:[%s1338_s8 + $0x28] sm:$0xff] %vm715_vm3, %v563_v39  ;;  %v567_v42 = vsub.f32 1.0, %v566_v38  ;;  %v391_v44 = vadd.f32 %v1116_v2, %v390_v41  ;;  %v701_v61 = vmul.f32 %v839_v51, %v1245_v29  ;;  %vm706_vm12 = vweird.f32 %v839_v51 }
 0x1fe   :  { %v693_v0 = vsel %vm1267_vm7, %v833_v28, %v689_v55  ;;  %v589_v13 = vand.u32 2147483647, %v1249_v36  ;;  %vm585_vm14 = vweird.f32 %v1249_v36  ;;  %vm1295_vm15 = vmor %vm705_vm11, %vm706_vm12  ;;  %v592_v12 = vor.u32 1.1754944e-38, %v591_v3 }
 0x1ff   :  { %v568_v48 = vmul.f32 %v837_v34, %v567_v42  ;;  %v420_v50 = vsub.f32 0.0, %v391_v44  ;;  %v698_v6 = vsel %vm695_vm9, %v697_v56, %v693_v0  ;;  %v702_v8 = vsub.f32 1.0, %v701_v61 }
 0x200   :  { %730 = vst.msk [vmem:[%s1338_s8 + $0x70] sm:$0xff] %vm715_vm3, %v698_v6  ;;  %vm710_vm1 = vcmp.eq.f32.partialorder %v709_v9, 8.507059e+37  ;;  %vm590_vm2 = vcmp.eq.f32.partialorder %v589_v13, 8.507059e+37 }
 0x201   :  { %v841_v53 = vpop.eup %840  ;;  %v569_v54 = vadd.f32 %v837_v34, %v568_v48  ;;  %v445_v57 = vmul.f32 1.442695, %v420_v50  ;;  %v703_v14 = vmul.f32 %v839_v51, %v702_v8 }
 0x202   :  { %v843_v58 = vpop.eup %842  ;;  %v1271_v60 = vadd.f32 1.0, %v841_v53 }
 0x203   :  { %v573_v62 = vsel %vm572_vm8, %v837_v34, %v569_v54  ;;  %v581_v63 = vmul.f32 %v843_v58, %v1249_v36  ;;  %vm586_vm13 = vweird.f32 %v843_v58  ;;  %v704_v20 = vadd.f32 %v839_v51, %v703_v14 }
 0x204   :  { %v578_v1 = vsel %vm575_vm10, %v577_v59, %v573_v62  ;;  %844 = vrcp.f32 %v1271_v60  ;;  %v393_v4 = vpop.f32.mrf.mxu2  ;;  %vm587_vm0 = vmor %vm585_vm14, %vm586_vm13  ;;  %v606_v32 = vand.u32 2147483648, %v1271_v60  ;;  %v604_v34 = vand.u32 2147483647, %v1271_v60 }
 0x205   :  { %722 = vst.msk [vmem:[%s1338_s8 + $0x30] sm:$0xff] %vm715_vm3, %v578_v1  ;;  %v582_v5 = vsub.f32 1.0, %v581_v63  ;;  %846 = vpow2.f32 %v445_v57  ;;  %v394_v10 = vadd.f32 %v1116_v2, %v393_v4  ;;  %v708_v27 = vsel %vm1295_vm15, %v839_v51, %v704_v20 }
 0x206   :  { %v713_v30 = vsel %vm710_vm1, %v712_v18, %v708_v27  ;;  %vm600_vm5 = vweird.f32 %v1271_v60  ;;  %vm605_vm7 = vcmp.eq.f32.partialorder %v604_v34, 8.507059e+37 }
 0x207   :  { %v583_v11 = vmul.f32 %v843_v58, %v582_v5  ;;  %v421_v15 = vsub.f32 0.0, %v394_v10  ;;  %731 = vst.msk [vmem:[%s1338_s8 + $0x78] sm:$0xff] %vm715_vm3, %v713_v30 }
 0x209   :  { %v584_v17 = vadd.f32 %v843_v58, %v583_v11  ;;  %v447_v21 = vmul.f32 1.442695, %v421_v15 }
 0x20a   :  { %v845_v19 = vpop.eup %844 }
 0x20b   :  { %v847_v22 = vpop.eup %846  ;;  %v588_v23 = vsel %vm587_vm0, %v843_v58, %v584_v17  ;;  %v596_v24 = vmul.f32 %v845_v19, %v1271_v60  ;;  %848 = vpow2.f32 %v447_v21  ;;  %vm601_vm4 = vweird.f32 %v845_v19 }
 0x20c   :  { %v593_v25 = vsel %vm590_vm2, %v592_v12, %v588_v23  ;;  %v468_v26 = vadd.f32 1.0, %v847_v22  ;;  %v396_v28 = vpop.f32.mrf.mxu2  ;;  %vm602_vm6 = vmor %vm600_vm5, %vm601_vm4 }
 0x20d   :  { %723 = vst.msk [vmem:[%s1338_s8 + $0x38] sm:$0xff] %vm715_vm3, %v593_v25  ;;  %v597_v29 = vsub.f32 1.0, %v596_v24  ;;  %v397_v31 = vadd.f32 %v1116_v2, %v396_v28  ;;  %v607_v2 = vor.u32 1.1754944e-38, %v606_v32 }
 0x20e   :  { %850 = vrcp.f32 %v468_v26  ;;  %v621_v45 = vand.u32 2147483648, %v468_v26  ;;  %v619_v48 = vand.u32 2147483647, %v468_v26  ;;  %vm615_vm9 = vweird.f32 %v468_v26 }
 0x20f   :  { %v598_v33 = vmul.f32 %v845_v19, %v597_v29  ;;  %v422_v35 = vsub.f32 0.0, %v397_v31 }
 0x210   :  { %v622_v52 = vor.u32 1.1754944e-38, %v621_v45  ;;  %vm620_vm11 = vcmp.eq.f32.partialorder %v619_v48, 8.507059e+37 }
 0x211   :  { %v599_v36 = vadd.f32 %v845_v19, %v598_v33  ;;  %v449_v37 = vmul.f32 1.442695, %v422_v35  ;;  %v849_v38 = vpop.eup %848 }
 0x212   :  { %v469_v40 = vadd.f32 1.0, %v849_v38 }
 0x213   :  { %v603_v39 = vsel %vm602_vm6, %v845_v19, %v599_v36  ;;  %852 = vpow2.f32 %v449_v37 }
 0x214   :  { %v851_v41 = vpop.eup %850  ;;  %v608_v42 = vsel %vm605_vm7, %v607_v2, %v603_v39  ;;  %854 = vrcp.f32 %v469_v40  ;;  %v636_v57 = vand.u32 2147483648, %v469_v40  ;;  %v634_v59 = vand.u32 2147483647, %v469_v40 }
 0x215   :  { %724 = vst.msk [vmem:[%s1338_s8 + $0x40] sm:$0xff] %vm715_vm3, %v608_v42  ;;  %v611_v43 = vmul.f32 %v851_v41, %v468_v26  ;;  %vm616_vm8 = vweird.f32 %v851_v41  ;;  %vm630_vm13 = vweird.f32 %v469_v40 }
 0x216   :  { %vm617_vm10 = vmor %vm615_vm9, %vm616_vm8  ;;  %v637_v62 = vor.u32 1.1754944e-38, %v636_v57  ;;  %vm635_vm15 = vcmp.eq.f32.partialorder %v634_v59, 8.507059e+37 }
 0x217   :  { %v612_v44 = vsub.f32 1.0, %v611_v43 }
 0x219   :  { %v853_v46 = vpop.eup %852  ;;  %v613_v47 = vmul.f32 %v851_v41, %v612_v44 }
 0x21a   :  { %v470_v49 = vadd.f32 1.0, %v853_v46  ;;  %v855_v50 = vpop.eup %854 }
 0x21b   :  { %v614_v51 = vadd.f32 %v851_v41, %v613_v47  ;;  %v626_v53 = vmul.f32 %v855_v50, %v469_v40  ;;  %vm631_vm12 = vweird.f32 %v855_v50 }
 0x21c   :  { %856 = vrcp.f32 %v470_v49  ;;  %vm632_vm14 = vmor %vm630_vm13, %vm631_vm12  ;;  %v651_v4 = vand.u32 2147483648, %v470_v49  ;;  %v649_v6 = vand.u32 2147483647, %v470_v49  ;;  %vm645_vm1 = vweird.f32 %v470_v49 }
 0x21d   :  { %v618_v54 = vsel %vm617_vm10, %v851_v41, %v614_v51  ;;  %v627_v56 = vsub.f32 1.0, %v626_v53 }
 0x21e   :  { %v623_v55 = vsel %vm620_vm11, %v622_v52, %v618_v54  ;;  %v652_v8 = vor.u32 1.1754944e-38, %v651_v4  ;;  %vm650_vm4 = vcmp.eq.f32.partialorder %v649_v6, 8.507059e+37 }
 0x21f   :  { %725 = vst.msk [vmem:[%s1338_s8 + $0x48] sm:$0xff] %vm715_vm3, %v623_v55  ;;  %v628_v58 = vmul.f32 %v855_v50, %v627_v56 }
 0x221   :  { %v629_v61 = vadd.f32 %v855_v50, %v628_v58 }
 0x222   :  { %v857_v60 = vpop.eup %856 }
 0x223   :  { %v641_v63 = vmul.f32 %v857_v60, %v470_v49  ;;  %v633_v0 = vsel %vm632_vm14, %v855_v50, %v629_v61  ;;  %vm646_vm0 = vweird.f32 %v857_v60 }
 0x224   :  { %v638_v1 = vsel %vm635_vm15, %v637_v62, %v633_v0  ;;  %vm647_vm2 = vmor %vm645_vm1, %vm646_vm0 }
 0x225   :  { %v642_v3 = vsub.f32 1.0, %v641_v63  ;;  %726 = vst.msk [vmem:[%s1338_s8 + $0x50] sm:$0xff] %vm715_vm3, %v638_v1 }
 0x227   :  { %v643_v5 = vmul.f32 %v857_v60, %v642_v3 }
 0x229   :  { %v644_v7 = vadd.f32 %v857_v60, %v643_v5 }
 0x22b   :  { %v648_v9 = vsel %vm647_vm2, %v857_v60, %v644_v7 }
 0x22c   :  { %v653_v10 = vsel %vm650_vm4, %v652_v8, %v648_v9 }
 0x22d   :  { %727 = vst.msk [vmem:[%s1338_s8 + $0x58] sm:$0xff] %vm715_vm3, %v653_v10 }
 0x22e   :  { %736 = vsyncpa [#allocation3], 1 }
 0x22f   :  { %737 = vsyncpa [#allocation5], 1 }

</bundles_post_ra>
